<compile_context>
chip_gen: v7x
topology: tpu7x:2x2x1
jax: 0.10.0
libtpu: 0.0.40
codegen_flags: <defaults>
</compile_context>

<pallas_src>
import functools

import jax
import jax.numpy as jnp
from jax.experimental import pallas as pl
from jax.experimental.pallas import tpu as pltpu


def _round_up(x, m):
    return ((x + m - 1) // m) * m


def actor_kernel(x_ref, w1_ref, b1_ref, w2_ref, b2_ref, wh_ref, bh_ref,
                 out_ref, *, use_bf16):
    # shared MLP: Linear(S,128) -> ReLU -> Linear(128,128pad) -> ReLU
    x = x_ref[...]
    if use_bf16:
        x = x.astype(jnp.bfloat16)          # weights already bf16 (wrapper cast)

    h1 = jnp.dot(x, w1_ref[...], preferred_element_type=jnp.float32) + b1_ref[...]
    h1 = jnp.maximum(h1, 0.0)               # bias add / ReLU stay f32 (v5e VPU)
    if use_bf16:
        h1 = h1.astype(jnp.bfloat16)

    h2 = jnp.dot(h1, w2_ref[...], preferred_element_type=jnp.float32) + b2_ref[...]
    h2 = jnp.maximum(h2, 0.0)
    if use_bf16:
        h2 = h2.astype(jnp.bfloat16)

    # fused heads: Linear(128pad, 128pad) -> single lane-dense store
    out = jnp.dot(h2, wh_ref[...], preferred_element_type=jnp.float32) + bh_ref[...]
    out_ref[...] = out.astype(out_ref.dtype)


def actor_forward(state, params, *, tile_b=2048, use_bf16=False,
                  out_dtype=jnp.float32):
    """state: (B, state_size) f32; params: dict of weights/biases.

    Returns (bid_logits, ask_logits), each (B, action_dim) f32.
    """
    B, S = state.shape
    H1 = params["w1"].shape[1]
    H2 = params["w2"].shape[1]
    action_dim = params["w_bid"].shape[1]

    # --- pad hidden width H2 -> 128 lanes (identity: ReLU(0)=0, zero head rows)
    H2p = _round_up(max(H2, 128), 128)
    w2 = params["w2"]
    b2 = params["b2"]
    if H2p != H2:
        w2 = jnp.pad(w2, ((0, 0), (0, H2p - H2)))
        b2 = jnp.pad(b2, ((0, 0), (0, H2p - H2)))

    # --- fuse the two heads, pad rows to H2p and lanes to a 128-dense slab ---
    wh = jnp.concatenate([params["w_bid"], params["w_ask"]], axis=1)   # (H2, 2A)
    bh = jnp.concatenate([params["b_bid"], params["b_ask"]], axis=1)   # (1, 2A)
    out_w = _round_up(max(2 * action_dim, 128), 128)
    wh = jnp.pad(wh, ((0, H2p - H2), (0, out_w - 2 * action_dim)))
    bh = jnp.pad(bh, ((0, 0), (0, out_w - 2 * action_dim)))

    w1 = params["w1"]
    b1 = params["b1"]
    if use_bf16:
        # cast weights ONCE here (not per grid step in the kernel)
        w1 = w1.astype(jnp.bfloat16)
        w2 = w2.astype(jnp.bfloat16)
        wh = wh.astype(jnp.bfloat16)

    # --- batch tiling: minimal padding, >=2 tiles when feasible (v7x 2 TCs),
    #     tile capped so VMEM footprint stays small on v7x (64 MiB) ----------
    out_itemsize = jnp.dtype(out_dtype).itemsize
    sublane = 16 if (out_itemsize < 4 or state.dtype.itemsize < 4) else 8
    tile_b = min(max(tile_b, sublane), 8192)

    n_tiles = max(1, -(-B // tile_b))
    if n_tiles == 1 and B >= 2 * sublane:
        n_tiles = 2                       # shard across both TCs on v7x
    tile_b_eff = _round_up(-(-B // n_tiles), sublane)
    B_pad = n_tiles * tile_b_eff
    if B_pad != B:
        state = jnp.pad(state, ((0, B_pad - B), (0, 0)))

    # weights / biases: constant block index -> stay resident in VMEM across
    # all batch tiles (no re-DMA per grid step).
    def resident(shape):
        return pl.BlockSpec(shape, lambda i: (0, 0))

    kernel = functools.partial(actor_kernel, use_bf16=use_bf16)

    out = pl.pallas_call(
        kernel,
        out_shape=jax.ShapeDtypeStruct((B_pad, out_w), out_dtype),
        grid=(n_tiles,),
        in_specs=[
            pl.BlockSpec((tile_b_eff, S), lambda i: (i, 0)),   # state tile
            resident((S, H1)), resident((1, H1)),              # layer 1
            resident((H1, H2p)), resident((1, H2p)),           # layer 2 (padded)
            resident((H2p, out_w)), resident((1, out_w)),      # fused heads
        ],
        out_specs=pl.BlockSpec((tile_b_eff, out_w), lambda i: (i, 0)),
        compiler_params=pltpu.CompilerParams(
            dimension_semantics=("parallel",),
            # Large tiles on v5e exceed the 16 MiB scoped default; 32 MiB is
            # within every generation's budget (v7x default is already 32).
            vmem_limit_bytes=32 << 20),
    )(state, w1, b1, w2, b2, wh, bh)

    bid = out[:B, :action_dim].astype(jnp.float32)
    ask = out[:B, action_dim:2 * action_dim].astype(jnp.float32)
    return bid, ask


def init_params(key, state_size, action_dim):
    """Deterministic synthetic init (uniform, PyTorch-Linear-like scale)."""
    def linear(key, fan_in, fan_out):
        k_w, k_b = jax.random.split(key)
        bound = 1.0 / jnp.sqrt(fan_in)
        w = jax.random.uniform(k_w, (fan_in, fan_out), jnp.float32, -bound, bound)
        b = jax.random.uniform(k_b, (1, fan_out), jnp.float32, -bound, bound)
        return w, b

    k1, k2, k3, k4 = jax.random.split(key, 4)
    w1, b1 = linear(k1, state_size, 128)
    w2, b2 = linear(k2, 128, 64)
    w_bid, b_bid = linear(k3, 64, action_dim)
    w_ask, b_ask = linear(k4, 64, action_dim)
    return {"w1": w1, "b1": b1, "w2": w2, "b2": b2,
            "w_bid": w_bid, "b_bid": b_bid,
            "w_ask": w_ask, "b_ask": b_ask}


def actor_ref(state, params):
    """Pure-JAX reference of the PyTorch forward."""
    h = jnp.maximum(state @ params["w1"] + params["b1"], 0.0)
    h = jnp.maximum(h @ params["w2"] + params["b2"], 0.0)
    return h @ params["w_bid"] + params["b_bid"], h @ params["w_ask"] + params["b_ask"]


if __name__ == "__main__":
    key = jax.random.PRNGKey(0)
    k_params, k_state, k_state2 = jax.random.split(key, 3)

    batch = 8
    state_size = 32
    action_dim = 8

    params = init_params(k_params, state_size, action_dim)
    state = jax.random.normal(k_state, (batch, state_size), jnp.float32)

    # --- small batch, f32 matmuls + f32 out: exact-match check ---------------
    bid_logits, ask_logits = actor_forward(state, params, use_bf16=False)
    jax.block_until_ready((bid_logits, ask_logits))
    bid_r, ask_r = actor_ref(state, params)
    assert bid_logits.shape == (batch, action_dim)
    assert ask_logits.shape == (batch, action_dim)
    assert jnp.allclose(bid_logits, bid_r, atol=1e-5, rtol=1e-5)
    assert jnp.allclose(ask_logits, ask_r, atol=1e-5, rtol=1e-5)

    # --- larger (non-multiple) batch exercising the multi-tile + padding path
    big_batch = 300
    state_big = jax.random.normal(k_state2, (big_batch, state_size), jnp.float32)
    bid_b, ask_b = actor_forward(state_big, params, use_bf16=False)
    jax.block_until_ready((bid_b, ask_b))
    bid_br, ask_br = actor_ref(state_big, params)
    assert jnp.allclose(bid_b, bid_br, atol=1e-5, rtol=1e-5)
    assert jnp.allclose(ask_b, ask_br, atol=1e-5, rtol=1e-5)

    # --- bf16 operands + bf16 output slab (v6e/v7x fast path), loose tol -----
    bid_h, ask_h = actor_forward(state_big, params, use_bf16=True,
                                 out_dtype=jnp.bfloat16)
    jax.block_until_ready((bid_h, ask_h))
    assert jnp.allclose(bid_h, bid_br, atol=5e-2, rtol=5e-2)
    assert jnp.allclose(ask_h, ask_br, atol=5e-2, rtol=5e-2)

    print("KERNEL_OK")
</pallas_src>

<mosaic_0001>
module attributes {stable_mosaic.version = 11 : i64} {
  func.func @actor_kernel(%arg0: i32, %arg1: memref<8x32xf32, #tpu.memory_space<vmem>>, %arg2: memref<32x128xf32, #tpu.memory_space<vmem>>, %arg3: memref<1x128xf32, #tpu.memory_space<vmem>>, %arg4: memref<128x128xf32, #tpu.memory_space<vmem>>, %arg5: memref<1x128xf32, #tpu.memory_space<vmem>>, %arg6: memref<128x128xf32, #tpu.memory_space<vmem>>, %arg7: memref<1x128xf32, #tpu.memory_space<vmem>>, %arg8: memref<8x128xf32, #tpu.memory_space<vmem>>) attributes {dimension_semantics = [#tpu.dimension_semantics<parallel>], iteration_bounds = array<i64: 1>, scalar_prefetch = 0 : i64, scratch_operands = 0 : i64, tpu.core_type = #tpu.core_type<tc>, window_params = [{transform_indices = @transform_0, window_bounds = array<i64: 8, 32>}, {pipeline_mode = #tpu.pipeline_mode<synchronous>, transform_indices = @transform_1, window_bounds = array<i64: 32, 128>}, {pipeline_mode = #tpu.pipeline_mode<synchronous>, transform_indices = @transform_2, window_bounds = array<i64: 1, 128>}, {pipeline_mode = #tpu.pipeline_mode<synchronous>, transform_indices = @transform_3, window_bounds = array<i64: 128, 128>}, {pipeline_mode = #tpu.pipeline_mode<synchronous>, transform_indices = @transform_4, window_bounds = array<i64: 1, 128>}, {pipeline_mode = #tpu.pipeline_mode<synchronous>, transform_indices = @transform_5, window_bounds = array<i64: 128, 128>}, {pipeline_mode = #tpu.pipeline_mode<synchronous>, transform_indices = @transform_6, window_bounds = array<i64: 1, 128>}, {transform_indices = @transform_7, window_bounds = array<i64: 8, 128>}]} {
    %c0 = arith.constant 0 : index
    %c0_0 = arith.constant 0 : index
    %0 = vector.load %arg1[%c0, %c0_0] : memref<8x32xf32, #tpu.memory_space<vmem>>, vector<8x32xf32>
    %c0_1 = arith.constant 0 : index
    %c0_2 = arith.constant 0 : index
    %1 = vector.load %arg2[%c0_1, %c0_2] : memref<32x128xf32, #tpu.memory_space<vmem>>, vector<32x128xf32>
    %cst = arith.constant dense<0.000000e+00> : vector<8x128xf32>
    %2 = tpu.matmul %0, %1, %cst {dimension_numbers = #tpu.dot_dimension_numbers<[1], [0], [0], [1], [0, 0, 1, 1], [], []>} : vector<8x32xf32>, vector<32x128xf32>, vector<8x128xf32> -> vector<8x128xf32>
    %c0_3 = arith.constant 0 : index
    %c0_4 = arith.constant 0 : index
    %3 = vector.load %arg3[%c0_3, %c0_4] : memref<1x128xf32, #tpu.memory_space<vmem>>, vector<1x128xf32>
    %4 = vector.broadcast %3 : vector<1x128xf32> to vector<8x128xf32>
    %5 = arith.addf %2, %4 : vector<8x128xf32>
    %cst_5 = arith.constant 0.000000e+00 : f32
    %6 = vector.broadcast %cst_5 : f32 to vector<8x128xf32>
    %7 = arith.maximumf %5, %6 : vector<8x128xf32>
    %c0_6 = arith.constant 0 : index
    %c0_7 = arith.constant 0 : index
    %8 = vector.load %arg4[%c0_6, %c0_7] : memref<128x128xf32, #tpu.memory_space<vmem>>, vector<128x128xf32>
    %cst_8 = arith.constant dense<0.000000e+00> : vector<8x128xf32>
    %9 = tpu.matmul %7, %8, %cst_8 {dimension_numbers = #tpu.dot_dimension_numbers<[1], [0], [0], [1], [0, 0, 1, 1], [], []>} : vector<8x128xf32>, vector<128x128xf32>, vector<8x128xf32> -> vector<8x128xf32>
    %c0_9 = arith.constant 0 : index
    %c0_10 = arith.constant 0 : index
    %10 = vector.load %arg5[%c0_9, %c0_10] : memref<1x128xf32, #tpu.memory_space<vmem>>, vector<1x128xf32>
    %11 = vector.broadcast %10 : vector<1x128xf32> to vector<8x128xf32>
    %12 = arith.addf %9, %11 : vector<8x128xf32>
    %cst_11 = arith.constant 0.000000e+00 : f32
    %13 = vector.broadcast %cst_11 : f32 to vector<8x128xf32>
    %14 = arith.maximumf %12, %13 : vector<8x128xf32>
    %c0_12 = arith.constant 0 : index
    %c0_13 = arith.constant 0 : index
    %15 = vector.load %arg6[%c0_12, %c0_13] : memref<128x128xf32, #tpu.memory_space<vmem>>, vector<128x128xf32>
    %cst_14 = arith.constant dense<0.000000e+00> : vector<8x128xf32>
    %16 = tpu.matmul %14, %15, %cst_14 {dimension_numbers = #tpu.dot_dimension_numbers<[1], [0], [0], [1], [0, 0, 1, 1], [], []>} : vector<8x128xf32>, vector<128x128xf32>, vector<8x128xf32> -> vector<8x128xf32>
    %c0_15 = arith.constant 0 : index
    %c0_16 = arith.constant 0 : index
    %17 = vector.load %arg7[%c0_15, %c0_16] : memref<1x128xf32, #tpu.memory_space<vmem>>, vector<1x128xf32>
    %18 = vector.broadcast %17 : vector<1x128xf32> to vector<8x128xf32>
    %19 = arith.addf %16, %18 : vector<8x128xf32>
    %c0_17 = arith.constant 0 : index
    %c0_18 = arith.constant 0 : index
    %20 = vector.load %arg8[%c0_17, %c0_18] : memref<8x128xf32, #tpu.memory_space<vmem>>, vector<8x128xf32>
    tpu.vector_store %arg8[%c0_17, %c0_18], %19 {strides = array<i32>} : memref<8x128xf32, #tpu.memory_space<vmem>>, vector<8x128xf32>,
    return
  }
  func.func @transform_0(%arg0: i32) -> (i32, i32) {
    %c0_i32 = arith.constant 0 : i32
    %c0_i32_0 = arith.constant 0 : i32
    return %arg0, %c0_i32 : i32, i32
  }
  func.func @transform_1(%arg0: i32) -> (i32, i32) {
    %c0_i32 = arith.constant 0 : i32
    %c0_i32_0 = arith.constant 0 : i32
    %c0_i32_1 = arith.constant 0 : i32
    return %c0_i32, %c0_i32_0 : i32, i32
  }
  func.func @transform_2(%arg0: i32) -> (i32, i32) {
    %c0_i32 = arith.constant 0 : i32
    %c0_i32_0 = arith.constant 0 : i32
    %c0_i32_1 = arith.constant 0 : i32
    return %c0_i32, %c0_i32_0 : i32, i32
  }
  func.func @transform_3(%arg0: i32) -> (i32, i32) {
    %c0_i32 = arith.constant 0 : i32
    %c0_i32_0 = arith.constant 0 : i32
    %c0_i32_1 = arith.constant 0 : i32
    return %c0_i32, %c0_i32_0 : i32, i32
  }
  func.func @transform_4(%arg0: i32) -> (i32, i32) {
    %c0_i32 = arith.constant 0 : i32
    %c0_i32_0 = arith.constant 0 : i32
    %c0_i32_1 = arith.constant 0 : i32
    return %c0_i32, %c0_i32_0 : i32, i32
  }
  func.func @transform_5(%arg0: i32) -> (i32, i32) {
    %c0_i32 = arith.constant 0 : i32
    %c0_i32_0 = arith.constant 0 : i32
    %c0_i32_1 = arith.constant 0 : i32
    return %c0_i32, %c0_i32_0 : i32, i32
  }
  func.func @transform_6(%arg0: i32) -> (i32, i32) {
    %c0_i32 = arith.constant 0 : i32
    %c0_i32_0 = arith.constant 0 : i32
    %c0_i32_1 = arith.constant 0 : i32
    return %c0_i32, %c0_i32_0 : i32, i32
  }
  func.func @transform_7(%arg0: i32) -> (i32, i32) {
    %c0_i32 = arith.constant 0 : i32
    %c0_i32_0 = arith.constant 0 : i32
    return %arg0, %c0_i32 : i32, i32
  }
}

</mosaic_0001>

<bundles_post_ra>
// kernel: tpu_custom_call.1
= control target key start
LH: loop header
LB: loop body
LE: loop exit
PB: predicated region body
PF: predicated region fallthrough
CT: control target
= control target key end

     0   :  { %12 = vsyncpa [#allocation3], 0  ;;  %s827_s0 = inlined_call_operand.hbm [shape: f32[8,32], index: 0, kind: input, shape index: {}]   ;;  %s828_s1 = inlined_call_operand.hbm [shape: f32[32,128], index: 1, kind: input, shape index: {}]   ;;  %s829_s2 = inlined_call_operand.vmem [shape: f32[1,128], index: 2, kind: input, shape index: {}]   ;;  %s830_s3 = inlined_call_operand.hbm [shape: f32[128,128], index: 3, kind: input, shape index: {}]   ;;  %s831_s4 = inlined_call_operand.vmem [shape: f32[1,128], index: 4, kind: input, shape index: {}]   ;;  %s832_s5 = inlined_call_operand.hbm [shape: f32[128,128], index: 5, kind: input, shape index: {}]   ;;  %s833_s6 = inlined_call_operand.vmem [shape: f32[1,128], index: 6, kind: input, shape index: {}]   ;;  %s834_s7 = inlined_call_operand.hbm [shape: f32[8,128], index: 7, kind: output, shape index: {}]  }
   0x1   :  { %13 = vsyncpa [#allocation6], 0 }
   0x2   :  { %14 = vsyncpa [#allocation9], 0 }
   0x3   :  { %15 = vsyncpa [#allocation4], 0  ;;  %s678_s24 = smov [#allocation5]   ;;  %s560_s28 = scalar_lea.hbm %s828_s1, 512 }
   0x4   :  { %s31_s25 = sshll.u32 %s678_s24, 4  ;;  %p561_p0 = scmp.ne.s32.totalorder %s828_s1, %s560_s28  ;;  %s32_s25 = int_to_ptr.vmem [resolvable:$true] %s31_s25 }
   0x5   :  { %p564_p1 = scmp.lt.u32.totalorder %s560_s28, %s828_s1 }
   0x7   :  { %p566_p2 = pnand %p564_p1, %p561_p0 }
   0x9   :  { %569 = shalt.err (!%p566_p2)
}
   0xa   :  { %s570_s10 = scalar_lea.vmem %s32_s25, 512  ;;  %p575_p4 = scmp.lt.s32.totalorder %s32_s25, %s32_s25 }
   0xb   :  { %p571_p3 = scmp.ne.s32.totalorder %s32_s25, %s570_s10  ;;  %p576_p5 = scmp.lt.s32.totalorder %s570_s10, %s570_s10 }
   0xd   :  { %p577_p6 = por %p576_p5, %p575_p4 }
   0xf   :  { %p578_p7 = pnand %p577_p6, %p571_p3 }
  0x11   :  { %581 = shalt.err (!%p578_p7)
}
  0x12   :  { %s679_s11 = smov 128   ;;  %s680_s12 = smov 8  }
  0x13   :  { %37 = dma.hbm_to_vmem [thread:$0]  %s828_s1, 512, %s32_s25, [#allocation6], %s679_s11, %s679_s11, %s680_s12  }
  0x14   :  { %s681_s15 = smov [#allocation2]   ;;  %s682_s17 = smov [#allocation7]  }
  0x15   :  { %s22_s16 = sshll.u32 %s681_s15, 4  ;;  %s45_s18 = sshll.u32 %s682_s17, 4  ;;  %s23_s16 = int_to_ptr.vmem [resolvable:$true] %s22_s16  ;;  %s46_s18 = int_to_ptr.vmem [resolvable:$true] %s45_s18 }
  0x16   :  { %s582_s21 = scalar_lea.hbm %s827_s0, 128 }
  0x17   :  { %p583_p8 = scmp.ne.s32.totalorder %s827_s0, %s582_s21  ;;  %p586_p9 = scmp.lt.u32.totalorder %s582_s21, %s827_s0 }
  0x19   :  { %p588_p10 = pnand %p586_p9, %p583_p8 }
  0x1b   :  { %591 = shalt.err (!%p588_p10)
}
  0x1c   :  { %s592_s1 = scalar_lea.vmem %s23_s16, 128  ;;  %p597_p12 = scmp.lt.s32.totalorder %s23_s16, %s23_s16 }
  0x1d   :  { %p593_p11 = scmp.ne.s32.totalorder %s23_s16, %s592_s1  ;;  %p598_p13 = scmp.lt.s32.totalorder %s592_s1, %s592_s1 }
  0x1f   :  { %p599_p0 = por %p598_p13, %p597_p12 }
  0x21   :  { %p600_p1 = pnand %p599_p0, %p593_p11 }
  0x23   :  { %603 = shalt.err (!%p600_p1)
}
  0x24   :  { %25 = dma.hbm_to_vmem [thread:$0]  %s827_s0, 128, %s23_s16, [#allocation3]  }
  0x25   :  { %s604_s30 = scalar_lea.hbm %s830_s3, 2048 }
  0x26   :  { %p605_p2 = scmp.ne.s32.totalorder %s830_s3, %s604_s30  ;;  %p608_p3 = scmp.lt.u32.totalorder %s604_s30, %s830_s3 }
  0x28   :  { %p610_p4 = pnand %p608_p3, %p605_p2 }
  0x2a   :  { %613 = shalt.err (!%p610_p4)
}
  0x2b   :  { %s614_s14 = scalar_lea.vmem %s46_s18, 2048  ;;  %p619_p6 = scmp.lt.s32.totalorder %s46_s18, %s46_s18 }
  0x2c   :  { %p615_p5 = scmp.ne.s32.totalorder %s46_s18, %s614_s14  ;;  %p620_p7 = scmp.lt.s32.totalorder %s614_s14, %s614_s14 }
  0x2e   :  { %p621_p8 = por %p620_p7, %p619_p6 }
  0x30   :  { %p622_p9 = pnand %p621_p8, %p615_p5 }
  0x32   :  { %625 = shalt.err (!%p622_p9)
}
  0x33   :  { %51 = dma.hbm_to_vmem [thread:$0]  %s830_s3, 2048, %s46_s18, [#allocation6], %s679_s11, %s679_s11, %s680_s12  }
  0x34   :  { %s683_s16 = smov [#allocation8]   ;;  %s626_s21 = scalar_lea.hbm %s832_s5, 2048 }
  0x35   :  { %s59_s17 = sshll.u32 %s683_s16, 4  ;;  %p627_p10 = scmp.ne.s32.totalorder %s832_s5, %s626_s21  ;;  %s60_s17 = int_to_ptr.vmem [resolvable:$true] %s59_s17 }
  0x36   :  { %p630_p11 = scmp.lt.u32.totalorder %s626_s21, %s832_s5 }
  0x38   :  { %p632_p12 = pnand %p630_p11, %p627_p10 }
  0x3a   :  { %635 = shalt.err (!%p632_p12)
}
  0x3b   :  { %s636_s1 = scalar_lea.vmem %s60_s17, 2048  ;;  %p641_p0 = scmp.lt.s32.totalorder %s60_s17, %s60_s17 }
  0x3c   :  { %p637_p13 = scmp.ne.s32.totalorder %s60_s17, %s636_s1  ;;  %p642_p1 = scmp.lt.s32.totalorder %s636_s1, %s636_s1 }
  0x3e   :  { %p643_p2 = por %p642_p1, %p641_p0 }
  0x40   :  { %p644_p3 = pnand %p643_p2, %p637_p13 }
  0x42   :  { %647 = shalt.err (!%p644_p3)
}
  0x43   :  { %65 = dma.hbm_to_vmem [thread:$0]  %s832_s5, 2048, %s60_s17, [#allocation9], %s679_s11, %s679_s11, %s680_s12  }
  0x44   :  { %670 = dma.done.wait [#allocation3], 128  }
  0x45   :  { %671 = vsyncadd [#allocation3], 4294967168 }
  0x46   :  { %672 = dma.done.wait [#allocation6], 2560  }
  0x47   :  { %673 = vsyncadd [#allocation6], 4294964736 }
  0x48   :  { %674 = dma.done.wait [#allocation9], 2048  }
  0x49   :  { %675 = vsyncadd [#allocation9], 4294965248  ;;  %v684_v0 = vmov 0.0|0.0   ;;  %vm685_vm0 = vmmov 0   ;;  %v686_v1 = vmov 0.0   ;;  %v81_v2 = vld [vmem:[#allocation5] sm:$0xff] }
  0x4a   :  { %496 = vmatprep.subr.bf16.mxu0 %v684_v0  ;;  %423 = vmatprep.mubr.msk.f32.mxu0 %vm685_vm0, %v686_v1  ;;  %v82_v3 = vld [vmem:[#allocation5 + $0x8] sm:$0xff]  ;;  %v83_v4 = vld [vmem:[#allocation5 + $0x10] sm:$0xff]  ;;  %v84_v6 = vld [vmem:[#allocation5 + $0x18] sm:$0xff]  ;;  %vm92_vm1 = vcmask 261120   ;;  %s687_s28 = smov [#allocation10]  }
  0x4b   :  { %502 = vmatprep.subr.bf16.mxu1 %v684_v0  ;;  %458 = vmatprep.mubr.msk.f32.mxu1 %vm685_vm0, %v686_v1  ;;  %v497_v5 = vpack.c.bf16 %v82_v3, %v81_v2  ;;  %v167_v7 = vld [vmem:[#allocation7] sm:$0xff]  ;;  %v168_v8 = vld [vmem:[#allocation7 + $0x8] sm:$0xff]  ;;  %v169_v9 = vld [vmem:[#allocation7 + $0x10] sm:$0xff]  ;;  %v500_v11 = vpack.c.bf16 %v84_v6, %v83_v4  ;;  %s361_s29 = sshll.u32 %s687_s28, 4  ;;  %s362_s29 = int_to_ptr.vmem [resolvable:$true] %s361_s29 }
  0x4c   :  { %v170_v10 = vld [vmem:[#allocation7 + $0x18] sm:$0xff]  ;;  %v503_v12 = vpack.c.bf16 %v168_v8, %v167_v7  ;;  %v171_v14 = vld [vmem:[#allocation7 + $0x20] sm:$0xff]  ;;  %v172_v15 = vld [vmem:[#allocation7 + $0x28] sm:$0xff]  ;;  %s648_s30 = scalar_lea.vmem %s362_s29, 128  ;;  %p653_p5 = scmp.lt.s32.totalorder %s362_s29, %s362_s29 }
  0x4d   :  { %498 = vmatpush3.bf16.msra.mxu0 %v497_v5  ;;  %v506_v13 = vpack.c.bf16 %v170_v10, %v169_v9  ;;  %v80_v16 = vld [vmem:[#allocation2] sm:$0xff]  ;;  %v509_v17 = vpack.c.bf16 %v172_v15, %v171_v14  ;;  %v173_v18 = vld [vmem:[#allocation7 + $0x30] sm:$0xff]  ;;  %v175_v21 = vld [vmem:[#allocation7 + $0x40] sm:$0xff]  ;;  %p649_p4 = scmp.ne.s32.totalorder %s362_s29, %s648_s30  ;;  %p654_p6 = scmp.lt.s32.totalorder %s648_s30, %s648_s30 }
  0x4e   :  { %499 = vmatprep.subr.bf16.mxu0 %v684_v0  ;;  %504 = vmatpush3.bf16.msra.mxu1 %v503_v12  ;;  %v174_v19 = vld [vmem:[#allocation7 + $0x38] sm:$0xff]  ;;  %v176_v22 = vld [vmem:[#allocation7 + $0x48] sm:$0xff]  ;;  %v177_v24 = vld [vmem:[#allocation7 + $0x50] sm:$0xff] }
  0x4f   :  { %505 = vmatprep.subr.bf16.mxu1 %v684_v0  ;;  %v512_v20 = vpack.c.bf16 %v174_v19, %v173_v18  ;;  %v515_v23 = vpack.c.bf16 %v176_v22, %v175_v21  ;;  %v178_v25 = vld [vmem:[#allocation7 + $0x58] sm:$0xff]  ;;  %v179_v27 = vld [vmem:[#allocation7 + $0x60] sm:$0xff]  ;;  %v180_v28 = vld [vmem:[#allocation7 + $0x68] sm:$0xff]  ;;  %p655_p7 = por %p654_p6, %p653_p5 }
  0x50   :  { %v518_v26 = vpack.c.bf16 %v178_v25, %v177_v24  ;;  %v521_v29 = vpack.c.bf16 %v180_v28, %v179_v27  ;;  %v181_v30 = vld [vmem:[#allocation7 + $0x70] sm:$0xff]  ;;  %v182_v31 = vld [vmem:[#allocation7 + $0x78] sm:$0xff]  ;;  %v261_v33 = vld [vmem:[#allocation8] sm:$0xff] }
  0x51   :  { %501 = vmatpush3.bf16.msra.mxu0 %v500_v11  ;;  %v524_v32 = vpack.c.bf16 %v182_v31, %v181_v30  ;;  %v262_v34 = vld [vmem:[#allocation8 + $0x8] sm:$0xff]  ;;  %v263_v35 = vld [vmem:[#allocation8 + $0x10] sm:$0xff]  ;;  %v264_v37 = vld [vmem:[#allocation8 + $0x18] sm:$0xff]  ;;  %p656_p8 = pnand %p655_p7, %p649_p4 }
  0x52   :  { %526 = vmatprep.subr.bf16.mxu0 %v684_v0  ;;  %507 = vmatpush3.bf16.msra.mxu1 %v506_v13  ;;  %v527_v36 = vpack.c.bf16 %v262_v34, %v261_v33  ;;  %v530_v38 = vpack.c.bf16 %v264_v37, %v263_v35  ;;  %v265_v39 = vld [vmem:[#allocation8 + $0x20] sm:$0xff]  ;;  %v266_v40 = vld [vmem:[#allocation8 + $0x28] sm:$0xff]  ;;  %v267_v42 = vld [vmem:[#allocation8 + $0x30] sm:$0xff] }
  0x53   :  { %508 = vmatprep.subr.bf16.mxu1 %v684_v0  ;;  %v533_v41 = vpack.c.bf16 %v266_v40, %v265_v39  ;;  %v268_v43 = vld [vmem:[#allocation8 + $0x38] sm:$0xff]  ;;  %v269_v45 = vld [vmem:[#allocation8 + $0x40] sm:$0xff]  ;;  %v270_v46 = vld [vmem:[#allocation8 + $0x48] sm:$0xff] }
  0x54   :  { %424 = vmatmul.mubr.msk.f32.vlgmr.msra.gmra.mrb[0].mxu0 %vm92_vm1, %v80_v16  ;;  %v536_v44 = vpack.c.bf16 %v268_v43, %v267_v42  ;;  %v539_v47 = vpack.c.bf16 %v270_v46, %v269_v45  ;;  %v271_v48 = vld [vmem:[#allocation8 + $0x50] sm:$0xff]  ;;  %v272_v49 = vld [vmem:[#allocation8 + $0x58] sm:$0xff]  ;;  %v273_v51 = vld [vmem:[#allocation8 + $0x60] sm:$0xff] }
  0x55   :  { %493 = vmatprep.mubr.msk.f32.mxu0 %vm685_vm0, %v686_v1  ;;  %528 = vmatpush3.bf16.msra.mxu0 %v527_v36  ;;  %v542_v50 = vpack.c.bf16 %v272_v49, %v271_v48  ;;  %v274_v52 = vld [vmem:[#allocation8 + $0x68] sm:$0xff]  ;;  %v372_v54 = vld [vmem:[%s829_s2] ss:$0 sm:$0xff]  ;;  %v275_v59 = vld [vmem:[#allocation8 + $0x70] sm:$0xff] }
  0x56   :  { %510 = vmatpush3.bf16.msra.mxu1 %v509_v17  ;;  %529 = vmatprep.subr.bf16.mxu0 %v684_v0  ;;  %v545_v53 = vpack.c.bf16 %v274_v52, %v273_v51  ;;  %v276_v60 = vld [vmem:[#allocation8 + $0x78] sm:$0xff] }
  0x57   :  { %511 = vmatprep.subr.bf16.mxu1 %v684_v0  ;;  %v548_v61 = vpack.c.bf16 %v276_v60, %v275_v59  ;;  %v374_v62 = vld [vmem:[%s831_s4] ss:$0 sm:$0xff] }
  0x58   :  { %v375_v3 = vld [vmem:[%s833_s6] ss:$0 sm:$0xff] }
  0x59   :  { %531 = vmatpush3.bf16.msra.mxu0 %v530_v38 }
  0x5a   :  { %513 = vmatpush3.bf16.msra.mxu1 %v512_v20  ;;  %532 = vmatprep.subr.bf16.mxu0 %v684_v0 }
  0x5b   :  { %514 = vmatprep.subr.bf16.mxu1 %v684_v0 }
  0x5d   :  { %534 = vmatpush3.bf16.msra.mxu0 %v533_v41 }
  0x5e   :  { %516 = vmatpush3.bf16.msra.mxu1 %v515_v23  ;;  %535 = vmatprep.subr.bf16.mxu0 %v684_v0 }
  0x5f   :  { %517 = vmatprep.subr.bf16.mxu1 %v684_v0 }
  0x61   :  { %537 = vmatpush3.bf16.msra.mxu0 %v536_v44 }
  0x62   :  { %519 = vmatpush3.bf16.msra.mxu1 %v518_v26  ;;  %538 = vmatprep.subr.bf16.mxu0 %v684_v0 }
  0x63   :  { %520 = vmatprep.subr.bf16.mxu1 %v684_v0 }
  0x65   :  { %540 = vmatpush3.bf16.msra.mxu0 %v539_v47 }
  0x66   :  { %522 = vmatpush3.bf16.msra.mxu1 %v521_v29  ;;  %541 = vmatprep.subr.bf16.mxu0 %v684_v0 }
  0x67   :  { %523 = vmatprep.subr.bf16.mxu1 %v684_v0 }
  0x69   :  { %543 = vmatpush3.bf16.msra.mxu0 %v542_v50 }
  0x6a   :  { %525 = vmatpush3.bf16.msra.mxu1 %v524_v32  ;;  %544 = vmatprep.subr.bf16.mxu0 %v684_v0 }
  0x6d   :  { %546 = vmatpush3.bf16.msra.mxu0 %v545_v53 }
  0x6e   :  { %547 = vmatprep.subr.bf16.mxu0 %v684_v0 }
  0x71   :  { %549 = vmatpush3.bf16.msra.mxu0 %v548_v61 }
 0x127   :  { %v162_v55 = vpop.f32.mrb[0].mxu0 }
 0x128   :  { %v163_v56 = vadd.f32 %v372_v54, %v162_v55  ;;  %v425_v57 = vpop.f32.mrb[1].mxu0 }
 0x12a   :  { %v166_v58 = vmax.f32 %v163_v56, 0.0 }
 0x12c   :  { %459 = vmatmul.mubr.f32.vlgmr.msra.gmra.mrb[0].mxu1 %v166_v58 }
 0x1ff   :  { %v256_v63 = vpop.f32.mrb[0].mxu1 }
 0x200   :  { %v257_v1 = vadd.f32 %v374_v62, %v256_v63  ;;  %v460_v0 = vpop.f32.mrb[1].mxu1 }
 0x202   :  { %v260_v2 = vmax.f32 %v257_v1, 0.0 }
 0x204   :  { %494 = vmatmul.mubr.f32.vlgmr.msra.gmra.mrb[2].mxu0 %v260_v2 }
 0x2d7   :  { %v350_v4 = vpop.f32.mrb[2].mxu0 }
 0x2d8   :  { %v351_v5 = vadd.f32 %v375_v3, %v350_v4  ;;  %v495_v6 = vpop.f32.mrb[3].mxu0 }
 0x2da   :  { %354 = vst [vmem:[#allocation10] sm:$0xff] %v351_v5 }
 0x2db   :  { %659 = shalt.err (!%p656_p8)
}
 0x2dc   :  { %s660_s9 = scalar_lea.hbm %s834_s7, 128 }
 0x2dd   :  { %p661_p9 = scmp.ne.s32.totalorder %s834_s7, %s660_s9  ;;  %p664_p10 = scmp.lt.u32.totalorder %s660_s9, %s834_s7 }
 0x2df   :  { %p666_p11 = pnand %p664_p10, %p661_p9 }
 0x2e1   :  { %669 = shalt.err (!%p666_p11)
}
 0x2e2   :  { %364 = dma.vmem_to_hbm [thread:$0]  %s362_s29, 128, %s834_s7, [#allocation4]  }
 0x2e3   :  { %676 = dma.done.wait [#allocation4], 128  }
 0x2e4   :  { %677 = vsyncadd [#allocation4], 4294967168 }
 0x2e5   :  { %368 = vsyncpa [#allocation3], 1 }
 0x2e6   :  { %369 = vsyncpa [#allocation6], 1 }
 0x2e7   :  { %370 = vsyncpa [#allocation9], 1 }
 0x2e8   :  { %371 = vsyncpa [#allocation4], 1 }

</bundles_post_ra>
